<compile_context>
chip_gen: v7x
topology: tpu7x:2x2x1
jax: 0.10.0
libtpu: 0.0.40
codegen_flags: <defaults>
</compile_context>

<pallas_src>
import functools

import jax
import jax.numpy as jnp
import numpy as np
from jax.experimental import pallas as pl
from jax.experimental.pallas import tpu as pltpu

EPS = 1e-5
LANE = 128


def _round_up(x, m):
    return (x + m - 1) // m * m


# ---------------------------------------------------------------------------
# Kernels
# ---------------------------------------------------------------------------
def _conv_stats_kernel(p_ref, w_ref, z_ref, st_ref):
    # One wide-K matmul (bf16 operands, f32 accumulate) + per-tile channel
    # sum / sum-of-squares partials for the two-phase BatchNorm.
    z = jnp.dot(p_ref[...], w_ref[...], preferred_element_type=jnp.float32)
    z_ref[...] = z
    s = jnp.sum(z, axis=0, keepdims=True)
    ss = jnp.sum(z * z, axis=0, keepdims=True)
    pad = jnp.zeros((6, z.shape[1]), jnp.float32)
    st_ref[...] = jnp.concatenate([s, ss, pad], axis=0)[None]


def _conv_proj_stats_kernel(p_ref, xs_ref, w_ref, wsc_ref, z_ref, zsc_ref, st_ref):
    # conv1 (3x3, wide-K) + fused 1x1 projection shortcut, with stat partials
    # for both BatchNorms.
    z = jnp.dot(p_ref[...], w_ref[...], preferred_element_type=jnp.float32)
    zsc = jnp.dot(xs_ref[...], wsc_ref[...], preferred_element_type=jnp.float32)
    z_ref[...] = z
    zsc_ref[...] = zsc
    s = jnp.sum(z, axis=0, keepdims=True)
    ss = jnp.sum(z * z, axis=0, keepdims=True)
    ssc = jnp.sum(zsc, axis=0, keepdims=True)
    sssc = jnp.sum(zsc * zsc, axis=0, keepdims=True)
    pad = jnp.zeros((4, z.shape[1]), jnp.float32)
    st_ref[...] = jnp.concatenate([s, ss, ssc, sssc, pad], axis=0)[None]


def _apply_proj_kernel(z2_ref, zsc_ref, aff_ref, o_ref):
    # BN2 + BN_shortcut (pre-folded per-channel scale/bias) + add + ReLU.
    left = z2_ref[...] * aff_ref[0:1, :] + aff_ref[1:2, :]
    right = zsc_ref[...] * aff_ref[2:3, :] + aff_ref[3:4, :]
    o_ref[...] = jnp.maximum(left + right, 0.0)


def _apply_id_kernel(z2_ref, xs_ref, aff_ref, o_ref):
    # BN2 (pre-folded) + identity shortcut + ReLU.
    left = z2_ref[...] * aff_ref[0:1, :] + aff_ref[1:2, :]
    o_ref[...] = jnp.maximum(left + xs_ref[...], 0.0)


# ---------------------------------------------------------------------------
# Wrapper-side helpers (pure slicing / padding; fused by XLA)
# ---------------------------------------------------------------------------
def _im2col_3x3(x_nhwc, stride):
    # 3x3 conv, padding=1: 9 shifted+strided taps concatenated along channels
    # -> (M, 9*C), tap-major / channel-minor (matches HWIO weight flatten).
    n, h, w, c = x_nhwc.shape
    ho = (h - 1) // stride + 1
    wo = (w - 1) // stride + 1
    xp = jnp.pad(x_nhwc, ((0, 0), (1, 1), (1, 1), (0, 0)))
    taps = []
    for ky in range(3):
        for kx in range(3):
            taps.append(xp[:, ky:ky + (ho - 1) * stride + 1:stride,
                            kx:kx + (wo - 1) * stride + 1:stride, :])
    patches = jnp.concatenate(taps, axis=-1).reshape(n * ho * wo, 9 * c)
    return patches, (n, ho, wo)


def _pad_cols(a, cols):
    return a if a.shape[1] == cols else jnp.pad(a, ((0, 0), (0, cols - a.shape[1])))


def _pad_rows(a, rows):
    return a if a.shape[0] == rows else jnp.pad(a, ((0, rows - a.shape[0]), (0, 0)))


def _fold_bn(s, ss, count, gamma, beta):
    # One-pass stats (var = E[x^2] - mean^2) folded into a single scale/bias.
    mean = s / count
    var = jnp.maximum(ss / count - mean * mean, 0.0)
    scale = gamma * jax.lax.rsqrt(var + EPS)
    bias = beta - mean * scale
    return scale, bias


# ---------------------------------------------------------------------------
# Forward
# ---------------------------------------------------------------------------
@functools.partial(jax.jit, static_argnums=2)
def resblock_forward(x_nchw, params, stride):
    cin = x_nchw.shape[1]
    cout = params["w1"].shape[-1]
    proj = (stride != 1) or (cin != cout)
    cp = _round_up(cout, LANE)                       # lane-dense channel dim

    x = jnp.transpose(x_nchw, (0, 2, 3, 1)).astype(jnp.float32)      # NHWC
    patches1, (n, ho, wo) = _im2col_3x3(x, stride)
    m = n * ho * wo
    tile_m = 512 if m >= 512 else _round_up(m, 8)
    m_pad = _round_up(m, tile_m)
    grid_t = m_pad // tile_m

    cparams = pltpu.CompilerParams(
        dimension_semantics=("parallel",),
        vmem_limit_bytes=48 * 1024 * 1024)

    def row_spec(tm, k):
        return pl.BlockSpec((tm, k), lambda i: (i, 0))

    def res_spec(shape):  # resident (same block every grid step)
        return pl.BlockSpec(shape, lambda i: (0,) * len(shape))

    st_spec = pl.BlockSpec((1, 8, cp), lambda i: (i, 0, 0))
    st_shape = jax.ShapeDtypeStruct((grid_t, 8, cp), jnp.float32)
    zmc_shape = jax.ShapeDtypeStruct((m_pad, cp), jnp.float32)

    # ----- conv1 (+ optional fused 1x1 projection) with BN-stat partials ----
    k1 = 9 * cin
    p1 = _pad_rows(patches1, m_pad).astype(jnp.bfloat16)
    w1 = _pad_cols(params["w1"].reshape(k1, cout), cp).astype(jnp.bfloat16)

    if proj:
        xs = _pad_rows(x[:, ::stride, ::stride, :].reshape(m, cin),
                       m_pad).astype(jnp.bfloat16)
        wsc = _pad_cols(params["wsc"].reshape(cin, cout), cp).astype(jnp.bfloat16)
        z1, zsc, st1 = pl.pallas_call(
            _conv_proj_stats_kernel,
            grid=(grid_t,),
            in_specs=[row_spec(tile_m, k1), row_spec(tile_m, cin),
                      res_spec((k1, cp)), res_spec((cin, cp))],
            out_specs=[row_spec(tile_m, cp), row_spec(tile_m, cp), st_spec],
            out_shape=[zmc_shape, zmc_shape, st_shape],
            compiler_params=cparams,
        )(p1, xs, w1, wsc)
    else:
        z1, st1 = pl.pallas_call(
            _conv_stats_kernel,
            grid=(grid_t,),
            in_specs=[row_spec(tile_m, k1), res_spec((k1, cp))],
            out_specs=[row_spec(tile_m, cp), st_spec],
            out_shape=[zmc_shape, st_shape],
            compiler_params=cparams,
        )(p1, w1)
        zsc = None

    st1r = jnp.sum(st1, axis=0)                                        # (8, cp)
    g1 = _pad_cols(params["g1"].reshape(1, cout), cp)
    b1 = _pad_cols(params["b1"].reshape(1, cout), cp)
    scale1, bias1 = _fold_bn(st1r[0:1], st1r[1:2], float(m), g1, b1)

    # BN1 + ReLU applied while forming the conv2 im2col input (XLA fuses it).
    y1 = jnp.maximum(z1[:m] * scale1 + bias1, 0.0)[:, :cout].reshape(n, ho, wo, cout)

    # ----- conv2 with BN-stat partials --------------------------------------
    patches2, _ = _im2col_3x3(y1, 1)
    k2 = 9 * cout
    p2 = _pad_rows(patches2, m_pad).astype(jnp.bfloat16)
    w2 = _pad_cols(params["w2"].reshape(k2, cout), cp).astype(jnp.bfloat16)

    z2, st2 = pl.pallas_call(
        _conv_stats_kernel,
        grid=(grid_t,),
        in_specs=[row_spec(tile_m, k2), res_spec((k2, cp))],
        out_specs=[row_spec(tile_m, cp), st_spec],
        out_shape=[zmc_shape, st_shape],
        compiler_params=cparams,
    )(p2, w2)

    st2r = jnp.sum(st2, axis=0)
    g2 = _pad_cols(params["g2"].reshape(1, cout), cp)
    b2 = _pad_cols(params["b2"].reshape(1, cout), cp)
    scale2, bias2 = _fold_bn(st2r[0:1], st2r[1:2], float(m), g2, b2)

    # ----- BN2 (+ shortcut BN) + residual add + ReLU ------------------------
    if proj:
        gsc = _pad_cols(params["gsc"].reshape(1, cout), cp)
        bsc = _pad_cols(params["bsc"].reshape(1, cout), cp)
        scale_sc, bias_sc = _fold_bn(st1r[2:3], st1r[3:4], float(m), gsc, bsc)
        aff = jnp.concatenate(
            [scale2, bias2, scale_sc, bias_sc, jnp.zeros((4, cp), jnp.float32)], axis=0)
        out = pl.pallas_call(
            _apply_proj_kernel,
            grid=(grid_t,),
            in_specs=[row_spec(tile_m, cp), row_spec(tile_m, cp), res_spec((8, cp))],
            out_specs=row_spec(tile_m, cp),
            out_shape=zmc_shape,
            compiler_params=cparams,
        )(z2, zsc, aff)
    else:
        aff = jnp.concatenate([scale2, bias2, jnp.zeros((6, cp), jnp.float32)], axis=0)
        xs_id = _pad_rows(_pad_cols(x.reshape(m, cin), cp), m_pad)
        out = pl.pallas_call(
            _apply_id_kernel,
            grid=(grid_t,),
            in_specs=[row_spec(tile_m, cp), row_spec(tile_m, cp), res_spec((8, cp))],
            out_specs=row_spec(tile_m, cp),
            out_shape=zmc_shape,
            compiler_params=cparams,
        )(z2, xs_id, aff)

    out = out[:m, :cout].reshape(n, ho, wo, cout)
    return jnp.transpose(out, (0, 3, 1, 2))          # back to NCHW


# ---------------------------------------------------------------------------
# Deterministic parameter init (shapes from the PyTorch module __init__)
# ---------------------------------------------------------------------------
def init_params(key, inchannel, outchannel, stride):
    proj = (stride != 1) or (inchannel != outchannel)
    keys = jax.random.split(key, 9)
    p = {
        "w1": 0.1 * jax.random.normal(keys[0], (3, 3, inchannel, outchannel), jnp.float32),
        "g1": 1.0 + 0.1 * jax.random.normal(keys[1], (outchannel,), jnp.float32),
        "b1": 0.1 * jax.random.normal(keys[2], (outchannel,), jnp.float32),
        "w2": 0.1 * jax.random.normal(keys[3], (3, 3, outchannel, outchannel), jnp.float32),
        "g2": 1.0 + 0.1 * jax.random.normal(keys[4], (outchannel,), jnp.float32),
        "b2": 0.1 * jax.random.normal(keys[5], (outchannel,), jnp.float32),
    }
    if proj:
        p["wsc"] = 0.1 * jax.random.normal(keys[6], (1, 1, inchannel, outchannel), jnp.float32)
        p["gsc"] = 1.0 + 0.1 * jax.random.normal(keys[7], (outchannel,), jnp.float32)
        p["bsc"] = 0.1 * jax.random.normal(keys[8], (outchannel,), jnp.float32)
    return p


# Pure-JAX f32 reference (matches PyTorch ResBlock.forward in training mode).
def resblock_reference(x_nchw, params, stride):
    x = jnp.transpose(x_nchw, (0, 2, 3, 1)).astype(jnp.float32)
    dn = ("NHWC", "HWIO", "NHWC")

    def bn(y, g, b):
        mean = jnp.mean(y, axis=(0, 1, 2), keepdims=True)
        var = jnp.mean(jnp.square(y - mean), axis=(0, 1, 2), keepdims=True)
        return (y - mean) * jax.lax.rsqrt(var + EPS) * g + b

    y = jax.lax.conv_general_dilated(x, params["w1"], (stride, stride),
                                     ((1, 1), (1, 1)), dimension_numbers=dn)
    y = jnp.maximum(bn(y, params["g1"], params["b1"]), 0.0)
    y = jax.lax.conv_general_dilated(y, params["w2"], (1, 1),
                                     ((1, 1), (1, 1)), dimension_numbers=dn)
    y = bn(y, params["g2"], params["b2"])
    proj = (stride != 1) or (x.shape[-1] != params["w1"].shape[-1])
    if proj:
        s = jax.lax.conv_general_dilated(x, params["wsc"], (stride, stride),
                                         ((0, 0), (0, 0)), dimension_numbers=dn)
        s = bn(s, params["gsc"], params["bsc"])
    else:
        s = x
    out = jnp.maximum(y + s, 0.0)
    return jnp.transpose(out, (0, 3, 1, 2))


if __name__ == "__main__":
    key = jax.random.PRNGKey(0)
    kx, kp1, kp2 = jax.random.split(key, 3)

    # Tolerances are loosened vs. the f32 reference because the conv matmuls
    # use bf16 MXU operands (accumulation and all BN math stay f32).
    RTOL, ATOL = 5e-2, 1e-1

    # Case 1: projection shortcut (stride=2, inchannel != outchannel).
    n, cin, h, w = 2, 4, 16, 16
    cout, stride = 8, 2
    x = jax.random.normal(kx, (n, cin, h, w), jnp.float32)
    params = init_params(kp1, cin, cout, stride)
    out = jax.block_until_ready(resblock_forward(x, params, stride))
    ref = resblock_reference(x, params, stride)
    np.testing.assert_allclose(np.asarray(out), np.asarray(ref), rtol=RTOL, atol=ATOL)

    # Case 2: identity shortcut (stride=1, inchannel == outchannel).
    params_id = init_params(kp2, cin, cin, 1)
    out_id = jax.block_until_ready(resblock_forward(x, params_id, 1))
    ref_id = resblock_reference(x, params_id, 1)
    np.testing.assert_allclose(np.asarray(out_id), np.asarray(ref_id), rtol=RTOL, atol=ATOL)

    print("KERNEL_OK")
</pallas_src>

<mosaic_0001>
module attributes {stable_mosaic.version = 11 : i64} {
  func.func @_conv_proj_stats_kernel(%arg0: i32, %arg1: memref<128x36xbf16, #tpu.memory_space<vmem>>, %arg2: memref<128x4xbf16, #tpu.memory_space<vmem>>, %arg3: memref<36x128xbf16, #tpu.memory_space<vmem>>, %arg4: memref<4x128xbf16, #tpu.memory_space<vmem>>, %arg5: memref<128x128xf32, #tpu.memory_space<vmem>>, %arg6: memref<128x128xf32, #tpu.memory_space<vmem>>, %arg7: memref<1x8x128xf32, #tpu.memory_space<vmem>>) attributes {dimension_semantics = [#tpu.dimension_semantics<parallel>], iteration_bounds = array<i64: 1>, scalar_prefetch = 0 : i64, scratch_operands = 0 : i64, tpu.core_type = #tpu.core_type<tc>, window_params = [{transform_indices = @transform_0, window_bounds = array<i64: 128, 36>}, {transform_indices = @transform_1, window_bounds = array<i64: 128, 4>}, {pipeline_mode = #tpu.pipeline_mode<synchronous>, transform_indices = @transform_2, window_bounds = array<i64: 36, 128>}, {pipeline_mode = #tpu.pipeline_mode<synchronous>, transform_indices = @transform_3, window_bounds = array<i64: 4, 128>}, {transform_indices = @transform_4, window_bounds = array<i64: 128, 128>}, {transform_indices = @transform_5, window_bounds = array<i64: 128, 128>}, {transform_indices = @transform_6, window_bounds = array<i64: 1, 8, 128>}]} {
    %c0 = arith.constant 0 : index
    %c0_0 = arith.constant 0 : index
    %0 = vector.load %arg1[%c0, %c0_0] : memref<128x36xbf16, #tpu.memory_space<vmem>>, vector<128x36xbf16>
    %c0_1 = arith.constant 0 : index
    %c0_2 = arith.constant 0 : index
    %1 = vector.load %arg3[%c0_1, %c0_2] : memref<36x128xbf16, #tpu.memory_space<vmem>>, vector<36x128xbf16>
    %cst = arith.constant dense<0.000000e+00> : vector<128x128xf32>
    %2 = tpu.matmul %0, %1, %cst {dimension_numbers = #tpu.dot_dimension_numbers<[1], [0], [0], [1], [0, 0, 1, 1], [], []>} : vector<128x36xbf16>, vector<36x128xbf16>, vector<128x128xf32> -> vector<128x128xf32>
    %c0_3 = arith.constant 0 : index
    %c0_4 = arith.constant 0 : index
    %3 = vector.load %arg2[%c0_3, %c0_4] : memref<128x4xbf16, #tpu.memory_space<vmem>>, vector<128x4xbf16>
    %c0_5 = arith.constant 0 : index
    %c0_6 = arith.constant 0 : index
    %4 = vector.load %arg4[%c0_5, %c0_6] : memref<4x128xbf16, #tpu.memory_space<vmem>>, vector<4x128xbf16>
    %cst_7 = arith.constant dense<0.000000e+00> : vector<128x128xf32>
    %5 = tpu.matmul %3, %4, %cst_7 {dimension_numbers = #tpu.dot_dimension_numbers<[1], [0], [0], [1], [0, 0, 1, 1], [], []>} : vector<128x4xbf16>, vector<4x128xbf16>, vector<128x128xf32> -> vector<128x128xf32>
    %c0_8 = arith.constant 0 : index
    %c0_9 = arith.constant 0 : index
    %6 = vector.load %arg5[%c0_8, %c0_9] : memref<128x128xf32, #tpu.memory_space<vmem>>, vector<128x128xf32>
    tpu.vector_store %arg5[%c0_8, %c0_9], %2 {strides = array<i32>} : memref<128x128xf32, #tpu.memory_space<vmem>>, vector<128x128xf32>,
    %c0_10 = arith.constant 0 : index
    %c0_11 = arith.constant 0 : index
    %7 = vector.load %arg6[%c0_10, %c0_11] : memref<128x128xf32, #tpu.memory_space<vmem>>, vector<128x128xf32>
    tpu.vector_store %arg6[%c0_10, %c0_11], %5 {strides = array<i32>} : memref<128x128xf32, #tpu.memory_space<vmem>>, vector<128x128xf32>,
    %cst_12 = arith.constant dense<0.000000e+00> : vector<128xf32>
    %8 = vector.multi_reduction <add>, %2, %cst_12 [0] : vector<128x128xf32> to vector<128xf32>
    %9 = vector.shape_cast %8 : vector<128xf32> to vector<1x128xf32>
    %10 = arith.mulf %2, %2 : vector<128x128xf32>
    %cst_13 = arith.constant dense<0.000000e+00> : vector<128xf32>
    %11 = vector.multi_reduction <add>, %10, %cst_13 [0] : vector<128x128xf32> to vector<128xf32>
    %12 = vector.shape_cast %11 : vector<128xf32> to vector<1x128xf32>
    %cst_14 = arith.constant dense<0.000000e+00> : vector<128xf32>
    %13 = vector.multi_reduction <add>, %5, %cst_14 [0] : vector<128x128xf32> to vector<128xf32>
    %14 = vector.shape_cast %13 : vector<128xf32> to vector<1x128xf32>
    %15 = arith.mulf %5, %5 : vector<128x128xf32>
    %cst_15 = arith.constant dense<0.000000e+00> : vector<128xf32>
    %16 = vector.multi_reduction <add>, %15, %cst_15 [0] : vector<128x128xf32> to vector<128xf32>
    %17 = vector.shape_cast %16 : vector<128xf32> to vector<1x128xf32>
    %cst_16 = arith.constant 0.000000e+00 : f32
    %18 = vector.broadcast %cst_16 : f32 to vector<4x128xf32>
    %19 = tpu.concatenate %9, %12, %14, %17, %18 in 0 : vector<1x128xf32>, vector<1x128xf32>, vector<1x128xf32>, vector<1x128xf32>, vector<4x128xf32> -> vector<8x128xf32>
    %20 = vector.shape_cast %19 : vector<8x128xf32> to vector<1x8x128xf32>
    %c0_17 = arith.constant 0 : index
    %c0_18 = arith.constant 0 : index
    %c0_19 = arith.constant 0 : index
    %21 = vector.load %arg7[%c0_17, %c0_18, %c0_19] : memref<1x8x128xf32, #tpu.memory_space<vmem>>, vector<1x8x128xf32>
    tpu.vector_store %arg7[%c0_17, %c0_18, %c0_19], %20 {strides = array<i32>} : memref<1x8x128xf32, #tpu.memory_space<vmem>>, vector<1x8x128xf32>,
    return
  }
  func.func @transform_0(%arg0: i32) -> (i32, i32) {
    %c0_i32 = arith.constant 0 : i32
    %c0_i32_0 = arith.constant 0 : i32
    return %arg0, %c0_i32 : i32, i32
  }
  func.func @transform_1(%arg0: i32) -> (i32, i32) {
    %c0_i32 = arith.constant 0 : i32
    %c0_i32_0 = arith.constant 0 : i32
    return %arg0, %c0_i32 : i32, i32
  }
  func.func @transform_2(%arg0: i32) -> (i32, i32) {
    %c0_i32 = arith.constant 0 : i32
    %c0_i32_0 = arith.constant 0 : i32
    %c0_i32_1 = arith.constant 0 : i32
    return %c0_i32, %c0_i32_0 : i32, i32
  }
  func.func @transform_3(%arg0: i32) -> (i32, i32) {
    %c0_i32 = arith.constant 0 : i32
    %c0_i32_0 = arith.constant 0 : i32
    %c0_i32_1 = arith.constant 0 : i32
    return %c0_i32, %c0_i32_0 : i32, i32
  }
  func.func @transform_4(%arg0: i32) -> (i32, i32) {
    %c0_i32 = arith.constant 0 : i32
    %c0_i32_0 = arith.constant 0 : i32
    return %arg0, %c0_i32 : i32, i32
  }
  func.func @transform_5(%arg0: i32) -> (i32, i32) {
    %c0_i32 = arith.constant 0 : i32
    %c0_i32_0 = arith.constant 0 : i32
    return %arg0, %c0_i32 : i32, i32
  }
  func.func @transform_6(%arg0: i32) -> (i32, i32, i32) {
    %c0_i32 = arith.constant 0 : i32
    %c0_i32_0 = arith.constant 0 : i32
    %c0_i32_1 = arith.constant 0 : i32
    return %arg0, %c0_i32, %c0_i32_0 : i32, i32, i32
  }
}

module attributes {stable_mosaic.version = 11 : i64} {
  func.func @_conv_stats_kernel(%arg0: i32, %arg1: memref<128x72xbf16, #tpu.memory_space<vmem>>, %arg2: memref<72x128xbf16, #tpu.memory_space<vmem>>, %arg3: memref<128x128xf32, #tpu.memory_space<vmem>>, %arg4: memref<1x8x128xf32, #tpu.memory_space<vmem>>) attributes {dimension_semantics = [#tpu.dimension_semantics<parallel>], iteration_bounds = array<i64: 1>, scalar_prefetch = 0 : i64, scratch_operands = 0 : i64, tpu.core_type = #tpu.core_type<tc>, window_params = [{transform_indices = @transform_0, window_bounds = array<i64: 128, 72>}, {pipeline_mode = #tpu.pipeline_mode<synchronous>, transform_indices = @transform_1, window_bounds = array<i64: 72, 128>}, {transform_indices = @transform_2, window_bounds = array<i64: 128, 128>}, {transform_indices = @transform_3, window_bounds = array<i64: 1, 8, 128>}]} {
    %c0 = arith.constant 0 : index
    %c0_0 = arith.constant 0 : index
    %0 = vector.load %arg1[%c0, %c0_0] : memref<128x72xbf16, #tpu.memory_space<vmem>>, vector<128x72xbf16>
    %c0_1 = arith.constant 0 : index
    %c0_2 = arith.constant 0 : index
    %1 = vector.load %arg2[%c0_1, %c0_2] : memref<72x128xbf16, #tpu.memory_space<vmem>>, vector<72x128xbf16>
    %cst = arith.constant dense<0.000000e+00> : vector<128x128xf32>
    %2 = tpu.matmul %0, %1, %cst {dimension_numbers = #tpu.dot_dimension_numbers<[1], [0], [0], [1], [0, 0, 1, 1], [], []>} : vector<128x72xbf16>, vector<72x128xbf16>, vector<128x128xf32> -> vector<128x128xf32>
    %c0_3 = arith.constant 0 : index
    %c0_4 = arith.constant 0 : index
    %3 = vector.load %arg3[%c0_3, %c0_4] : memref<128x128xf32, #tpu.memory_space<vmem>>, vector<128x128xf32>
    tpu.vector_store %arg3[%c0_3, %c0_4], %2 {strides = array<i32>} : memref<128x128xf32, #tpu.memory_space<vmem>>, vector<128x128xf32>,
    %cst_5 = arith.constant dense<0.000000e+00> : vector<128xf32>
    %4 = vector.multi_reduction <add>, %2, %cst_5 [0] : vector<128x128xf32> to vector<128xf32>
    %5 = vector.shape_cast %4 : vector<128xf32> to vector<1x128xf32>
    %6 = arith.mulf %2, %2 : vector<128x128xf32>
    %cst_6 = arith.constant dense<0.000000e+00> : vector<128xf32>
    %7 = vector.multi_reduction <add>, %6, %cst_6 [0] : vector<128x128xf32> to vector<128xf32>
    %8 = vector.shape_cast %7 : vector<128xf32> to vector<1x128xf32>
    %cst_7 = arith.constant 0.000000e+00 : f32
    %9 = vector.broadcast %cst_7 : f32 to vector<6x128xf32>
    %10 = tpu.concatenate %5, %8, %9 in 0 : vector<1x128xf32>, vector<1x128xf32>, vector<6x128xf32> -> vector<8x128xf32>
    %11 = vector.shape_cast %10 : vector<8x128xf32> to vector<1x8x128xf32>
    %c0_8 = arith.constant 0 : index
    %c0_9 = arith.constant 0 : index
    %c0_10 = arith.constant 0 : index
    %12 = vector.load %arg4[%c0_8, %c0_9, %c0_10] : memref<1x8x128xf32, #tpu.memory_space<vmem>>, vector<1x8x128xf32>
    tpu.vector_store %arg4[%c0_8, %c0_9, %c0_10], %11 {strides = array<i32>} : memref<1x8x128xf32, #tpu.memory_space<vmem>>, vector<1x8x128xf32>,
    return
  }
  func.func @transform_0(%arg0: i32) -> (i32, i32) {
    %c0_i32 = arith.constant 0 : i32
    %c0_i32_0 = arith.constant 0 : i32
    return %arg0, %c0_i32 : i32, i32
  }
  func.func @transform_1(%arg0: i32) -> (i32, i32) {
    %c0_i32 = arith.constant 0 : i32
    %c0_i32_0 = arith.constant 0 : i32
    %c0_i32_1 = arith.constant 0 : i32
    return %c0_i32, %c0_i32_0 : i32, i32
  }
  func.func @transform_2(%arg0: i32) -> (i32, i32) {
    %c0_i32 = arith.constant 0 : i32
    %c0_i32_0 = arith.constant 0 : i32
    return %arg0, %c0_i32 : i32, i32
  }
  func.func @transform_3(%arg0: i32) -> (i32, i32, i32) {
    %c0_i32 = arith.constant 0 : i32
    %c0_i32_0 = arith.constant 0 : i32
    %c0_i32_1 = arith.constant 0 : i32
    return %arg0, %c0_i32, %c0_i32_0 : i32, i32, i32
  }
}

module attributes {stable_mosaic.version = 11 : i64} {
  func.func @_apply_proj_kernel(%arg0: i32, %arg1: memref<128x128xf32, #tpu.memory_space<vmem>>, %arg2: memref<128x128xf32, #tpu.memory_space<vmem>>, %arg3: memref<8x128xf32, #tpu.memory_space<vmem>>, %arg4: memref<128x128xf32, #tpu.memory_space<vmem>>) attributes {dimension_semantics = [#tpu.dimension_semantics<parallel>], iteration_bounds = array<i64: 1>, scalar_prefetch = 0 : i64, scratch_operands = 0 : i64, tpu.core_type = #tpu.core_type<tc>, window_params = [{transform_indices = @transform_0, window_bounds = array<i64: 128, 128>}, {transform_indices = @transform_1, window_bounds = array<i64: 128, 128>}, {pipeline_mode = #tpu.pipeline_mode<synchronous>, transform_indices = @transform_2, window_bounds = array<i64: 8, 128>}, {transform_indices = @transform_3, window_bounds = array<i64: 128, 128>}]} {
    %c0 = arith.constant 0 : index
    %c0_0 = arith.constant 0 : index
    %0 = vector.load %arg1[%c0, %c0_0] : memref<128x128xf32, #tpu.memory_space<vmem>>, vector<128x128xf32>
    %c0_1 = arith.constant 0 : index
    %c0_2 = arith.constant 0 : index
    %1 = vector.load %arg3[%c0_1, %c0_2] : memref<8x128xf32, #tpu.memory_space<vmem>>, vector<1x128xf32>
    %2 = vector.broadcast %1 : vector<1x128xf32> to vector<128x128xf32>
    %3 = arith.mulf %0, %2 : vector<128x128xf32>
    %c1 = arith.constant 1 : index
    %c0_3 = arith.constant 0 : index
    %4 = vector.load %arg3[%c1, %c0_3] : memref<8x128xf32, #tpu.memory_space<vmem>>, vector<1x128xf32>
    %5 = vector.broadcast %4 : vector<1x128xf32> to vector<128x128xf32>
    %6 = arith.addf %3, %5 : vector<128x128xf32>
    %c0_4 = arith.constant 0 : index
    %c0_5 = arith.constant 0 : index
    %7 = vector.load %arg2[%c0_4, %c0_5] : memref<128x128xf32, #tpu.memory_space<vmem>>, vector<128x128xf32>
    %c2 = arith.constant 2 : index
    %c0_6 = arith.constant 0 : index
    %8 = vector.load %arg3[%c2, %c0_6] : memref<8x128xf32, #tpu.memory_space<vmem>>, vector<1x128xf32>
    %9 = vector.broadcast %8 : vector<1x128xf32> to vector<128x128xf32>
    %10 = arith.mulf %7, %9 : vector<128x128xf32>
    %c3 = arith.constant 3 : index
    %c0_7 = arith.constant 0 : index
    %11 = vector.load %arg3[%c3, %c0_7] : memref<8x128xf32, #tpu.memory_space<vmem>>, vector<1x128xf32>
    %12 = vector.broadcast %11 : vector<1x128xf32> to vector<128x128xf32>
    %13 = arith.addf %10, %12 : vector<128x128xf32>
    %14 = arith.addf %6, %13 : vector<128x128xf32>
    %cst = arith.constant 0.000000e+00 : f32
    %15 = vector.broadcast %cst : f32 to vector<128x128xf32>
    %16 = arith.maximumf %14, %15 : vector<128x128xf32>
    %c0_8 = arith.constant 0 : index
    %c0_9 = arith.constant 0 : index
    %17 = vector.load %arg4[%c0_8, %c0_9] : memref<128x128xf32, #tpu.memory_space<vmem>>, vector<128x128xf32>
    tpu.vector_store %arg4[%c0_8, %c0_9], %16 {strides = array<i32>} : memref<128x128xf32, #tpu.memory_space<vmem>>, vector<128x128xf32>,
    return
  }
  func.func @transform_0(%arg0: i32) -> (i32, i32) {
    %c0_i32 = arith.constant 0 : i32
    %c0_i32_0 = arith.constant 0 : i32
    return %arg0, %c0_i32 : i32, i32
  }
  func.func @transform_1(%arg0: i32) -> (i32, i32) {
    %c0_i32 = arith.constant 0 : i32
    %c0_i32_0 = arith.constant 0 : i32
    return %arg0, %c0_i32 : i32, i32
  }
  func.func @transform_2(%arg0: i32) -> (i32, i32) {
    %c0_i32 = arith.constant 0 : i32
    %c0_i32_0 = arith.constant 0 : i32
    %c0_i32_1 = arith.constant 0 : i32
    return %c0_i32, %c0_i32_0 : i32, i32
  }
  func.func @transform_3(%arg0: i32) -> (i32, i32) {
    %c0_i32 = arith.constant 0 : i32
    %c0_i32_0 = arith.constant 0 : i32
    return %arg0, %c0_i32 : i32, i32
  }
}

</mosaic_0001>

<bundles_post_ra>
// kernel: resblock_forward.4
= control target key start
LH: loop header
LB: loop body
LE: loop exit
PB: predicated region body
PF: predicated region fallthrough
CT: control target
= control target key end

     0   :  { %vm106_vm0 = vcmask 588800   ;;  %vm131_vm1 = vcmask 1043456   ;;  %vm306_vm2 = vcmask 1040384   ;;  %vm308_vm3 = vcmask 1041408   ;;  %s522_s1 = inlined_call_operand.vmem [shape: bf16[72,128], index: 1, kind: input, shape index: {}]   ;;  %s523_s0 = inlined_call_operand.vmem [shape: bf16[128,72], index: 0, kind: input, shape index: {}]   ;;  %s524_s2 = inlined_call_operand.vmem [shape: f32[128,128], index: 2, kind: output, shape index: {0}]   ;;  %s525_s3 = inlined_call_operand.vmem [shape: f32[1,8,128], index: 3, kind: output, shape index: {1}]  }
   0x1   :  { %v391_v0 = vld [vmem:[%s522_s1] sm:$0xff]   ;;  %v392_v1 = vld [vmem:[%s522_s1 + $0x8] sm:$0xff]   ;;  %v393_v2 = vld [vmem:[%s522_s1 + $0x10] sm:$0xff]  }
   0x2   :  { %353 = vmatprep.subr.bf16.mxu0 %v391_v0  ;;  %379 = vmatprep.subr.bf16.mxu1 %v391_v0  ;;  %v396_v3 = vld [vmem:[%s523_s0] sm:$0xff]   ;;  %v394_v4 = vld [vmem:[%s522_s1 + $0x18] sm:$0xff]   ;;  %v397_v8 = vld [vmem:[%s523_s0 + $0x8] sm:$0xff]  }
   0x3   :  { %354 = vmatpush3.bf16.msra.mxu0 %v391_v0  ;;  %384 = vmatpush3.bf16.msra.mxu1 %v391_v0  ;;  %v400_v5 = vld [vmem:[%s523_s0 + $0x20] sm:$0xff]   ;;  %v401_v9 = vld [vmem:[%s523_s0 + $0x28] sm:$0xff]   ;;  %v398_v10 = vld [vmem:[%s523_s0 + $0x10] sm:$0xff]  }
   0x4   :  { %355 = vmatprep.subr.bf16.mxu0 %v392_v1  ;;  %380 = vmatprep.subr.bf16.mxu1 %v392_v1  ;;  %v395_v6 = vld [vmem:[%s522_s1 + $0x20] ss:$0 sps:$4 sm:$0xff]   ;;  %v402_v11 = vld [vmem:[%s523_s0 + $0x30] sm:$0xff]   ;;  %v399_v12 = vld [vmem:[%s523_s0 + $0x18] sm:$0xff]  }
   0x5   :  { %363 = vmatprep.mubr.msk.bf16.mxu0 %vm106_vm0, %v396_v3  ;;  %371 = vmatprep.mubr.msk.bf16.mxu1 %vm106_vm0, %v400_v5  ;;  %v133_v7 = vsel %vm131_vm1, %v395_v6, 0  ;;  %v403_v13 = vld [vmem:[%s523_s0 + $0x38] sm:$0xff]  }
   0x7   :  { %356 = vmatpush3.bf16.msra.mxu0 %v392_v1  ;;  %385 = vmatpush3.bf16.msra.mxu1 %v392_v1 }
   0x8   :  { %357 = vmatprep.subr.bf16.mxu0 %v393_v2  ;;  %381 = vmatprep.subr.bf16.mxu1 %v393_v2 }
   0xb   :  { %358 = vmatpush3.bf16.msra.mxu0 %v393_v2  ;;  %386 = vmatpush3.bf16.msra.mxu1 %v393_v2 }
   0xc   :  { %359 = vmatprep.subr.bf16.mxu0 %v394_v4  ;;  %382 = vmatprep.subr.bf16.mxu1 %v394_v4 }
   0xf   :  { %360 = vmatpush3.bf16.msra.mxu0 %v394_v4  ;;  %387 = vmatpush3.bf16.msra.mxu1 %v394_v4 }
  0x10   :  { %389 = vmatprep.subr.msk.bf16.mxu0 %vm131_vm1, %v395_v6  ;;  %390 = vmatprep.subr.msk.bf16.mxu1 %vm131_vm1, %v395_v6 }
  0x13   :  { %362 = vmatpush3.bf16.msra.mxu0 %v133_v7  ;;  %388 = vmatpush3.bf16.msra.mxu1 %v133_v7 }
  0x16   :  { %364 = vmatmul.mubr.msk.bf16.vlgmr.msra.gmra.mrb[0].mxu0 %vm106_vm0, %v397_v8  ;;  %372 = vmatmul.mubr.msk.bf16.vlgmr.msra.gmra.mrb[0].mxu1 %vm106_vm0, %v401_v9 }
  0x17   :  { %367 = vmatprep.mubr.msk.bf16.mxu0 %vm106_vm0, %v398_v10  ;;  %375 = vmatprep.mubr.msk.bf16.mxu1 %vm106_vm0, %v402_v11 }
  0x1e   :  { %368 = vmatmul.mubr.msk.bf16.gmra.mrb[4].mxu0 %vm106_vm0, %v399_v12  ;;  %376 = vmatmul.mubr.msk.bf16.gmra.mrb[4].mxu1 %vm106_vm0, %v403_v13 }
  0xe9   :  { %v365_v14 = vpop.f32.mrb[0].mxu0  ;;  %v373_v15 = vpop.f32.mrb[0].mxu1 }
  0xea   :  { %234 = vst [vmem:[%s524_s2 + $0x10] sm:$0xff] %v365_v14  ;;  %v169_v16 = vpop.f32.mrb[1].mxu0  ;;  %242 = vst [vmem:[%s524_s2 + $0x50] sm:$0xff] %v373_v15  ;;  %v201_v17 = vpop.f32.mrb[1].mxu1  ;;  %v271_v25 = vmul.f32 %v365_v14, %v365_v14  ;;  %v279_v57 = vmul.f32 %v373_v15, %v373_v15 }
  0xeb   :  { %232 = vst [vmem:[%s524_s2] sm:$0xff] %v169_v16  ;;  %v366_v18 = vpop.f32.mrb[2].mxu0  ;;  %240 = vst [vmem:[%s524_s2 + $0x40] sm:$0xff] %v201_v17  ;;  %v374_v19 = vpop.f32.mrb[2].mxu1  ;;  %v269_v22 = vmul.f32 %v169_v16, %v169_v16  ;;  %v277_v51 = vmul.f32 %v201_v17, %v201_v17 }
  0xec   :  { %235 = vst [vmem:[%s524_s2 + $0x18] sm:$0xff] %v366_v18  ;;  %v172_v20 = vpop.f32.mrb[3].mxu0  ;;  %243 = vst [vmem:[%s524_s2 + $0x58] sm:$0xff] %v374_v19  ;;  %v204_v21 = vpop.f32.mrb[3].mxu1  ;;  %v272_v28 = vmul.f32 %v366_v18, %v366_v18  ;;  %v280_v60 = vmul.f32 %v374_v19, %v374_v19 }
  0xed   :  { %233 = vst [vmem:[%s524_s2 + $0x8] sm:$0xff] %v172_v20  ;;  %v248_v23 = vadd.f32 %v172_v20, %v169_v16  ;;  %v270_v24 = vmul.f32 %v172_v20, %v172_v20  ;;  %241 = vst [vmem:[%s524_s2 + $0x48] sm:$0xff] %v204_v21  ;;  %v278_v56 = vmul.f32 %v204_v21, %v204_v21 }
  0xef   :  { %v249_v26 = vadd.f32 %v365_v14, %v248_v23  ;;  %v285_v27 = vadd.f32 %v270_v24, %v269_v22 }
  0xf1   :  { %v286_v29 = vadd.f32 %v285_v27, %v271_v25  ;;  %v369_v30 = vpop.f32.mrb[4].mxu0  ;;  %v250_v31 = vadd.f32 %v366_v18, %v249_v26  ;;  %v377_v32 = vpop.f32.mrb[4].mxu1 }
  0xf2   :  { %238 = vst [vmem:[%s524_s2 + $0x30] sm:$0xff] %v369_v30  ;;  %v185_v33 = vpop.f32.mrb[5].mxu0  ;;  %246 = vst [vmem:[%s524_s2 + $0x70] sm:$0xff] %v377_v32  ;;  %v217_v34 = vpop.f32.mrb[5].mxu1  ;;  %v275_v45 = vmul.f32 %v369_v30, %v369_v30  ;;  %v283_v5 = vmul.f32 %v377_v32, %v377_v32 }
  0xf3   :  { %236 = vst [vmem:[%s524_s2 + $0x20] sm:$0xff] %v185_v33  ;;  %v251_v35 = vadd.f32 %v250_v31, %v185_v33  ;;  %v273_v36 = vmul.f32 %v185_v33, %v185_v33  ;;  %v287_v37 = vadd.f32 %v286_v29, %v272_v28  ;;  %v370_v38 = vpop.f32.mrb[6].mxu0  ;;  %244 = vst [vmem:[%s524_s2 + $0x60] sm:$0xff] %v217_v34  ;;  %v378_v39 = vpop.f32.mrb[6].mxu1 }
  0xf4   :  { %239 = vst [vmem:[%s524_s2 + $0x38] sm:$0xff] %v370_v38  ;;  %v188_v40 = vpop.f32.mrb[7].mxu0  ;;  %247 = vst [vmem:[%s524_s2 + $0x78] sm:$0xff] %v378_v39  ;;  %v220_v41 = vpop.f32.mrb[7].mxu1  ;;  %v276_v48 = vmul.f32 %v370_v38, %v370_v38  ;;  %v281_v63 = vmul.f32 %v217_v34, %v217_v34  ;;  %v284_v8 = vmul.f32 %v378_v39, %v378_v39 }
  0xf5   :  { %v288_v42 = vadd.f32 %v287_v37, %v273_v36  ;;  %237 = vst [vmem:[%s524_s2 + $0x28] sm:$0xff] %v188_v40  ;;  %v252_v43 = vadd.f32 %v251_v35, %v188_v40  ;;  %v274_v44 = vmul.f32 %v188_v40, %v188_v40  ;;  %245 = vst [vmem:[%s524_s2 + $0x68] sm:$0xff] %v220_v41 }
  0xf6   :  { %v282_v4 = vmul.f32 %v220_v41, %v220_v41 }
  0xf7   :  { %v253_v46 = vadd.f32 %v369_v30, %v252_v43  ;;  %v289_v47 = vadd.f32 %v288_v42, %v274_v44 }
  0xf9   :  { %v290_v49 = vadd.f32 %v289_v47, %v275_v45  ;;  %v254_v50 = vadd.f32 %v370_v38, %v253_v46 }
  0xfb   :  { %v255_v52 = vadd.f32 %v254_v50, %v201_v17  ;;  %v291_v53 = vadd.f32 %v290_v49, %v276_v48 }
  0xfd   :  { %v292_v54 = vadd.f32 %v291_v53, %v277_v51  ;;  %v256_v55 = vadd.f32 %v255_v52, %v204_v21 }
  0xff   :  { %v257_v58 = vadd.f32 %v373_v15, %v256_v55  ;;  %v293_v59 = vadd.f32 %v292_v54, %v278_v56 }
 0x101   :  { %v294_v61 = vadd.f32 %v293_v59, %v279_v57  ;;  %v258_v62 = vadd.f32 %v374_v19, %v257_v58 }
 0x103   :  { %v259_v0 = vadd.f32 %v258_v62, %v217_v34  ;;  %v295_v1 = vadd.f32 %v294_v61, %v280_v60 }
 0x105   :  { %v296_v2 = vadd.f32 %v295_v1, %v281_v63  ;;  %v260_v3 = vadd.f32 %v259_v0, %v220_v41 }
 0x107   :  { %v261_v6 = vadd.f32 %v377_v32, %v260_v3  ;;  %v297_v7 = vadd.f32 %v296_v2, %v282_v4 }
 0x109   :  { %v262_v9 = vadd.f32 %v378_v39, %v261_v6  ;;  %v298_v10 = vadd.f32 %v297_v7, %v283_v5 }
 0x10b   :  { %v263_v11 = vrot.slane %v262_v9, 4  ;;  %v299_v12 = vadd.f32 %v298_v10, %v284_v8 }
 0x10d   :  { %v264_v13 = vadd.f32 %v263_v11, %v262_v9  ;;  %v300_v14 = vrot.slane %v299_v12, 4 }
 0x10f   :  { %v265_v15 = vrot.slane %v264_v13, 2  ;;  %v301_v16 = vadd.f32 %v300_v14, %v299_v12 }
 0x111   :  { %v266_v17 = vadd.f32 %v265_v15, %v264_v13  ;;  %v302_v18 = vrot.slane %v301_v16, 2 }
 0x113   :  { %v267_v19 = vrot.slane %v266_v17, 1  ;;  %v303_v20 = vadd.f32 %v302_v18, %v301_v16 }
 0x115   :  { %v304_v21 = vrot.slane %v303_v20, 1  ;;  %v268_v22 = vadd.f32 %v267_v19, %v266_v17 }
 0x117   :  { %v305_v23 = vadd.f32 %v304_v21, %v303_v20 }
 0x119   :  { %v307_v24 = vsel %vm306_vm2, %v268_v22, %v305_v23 }
 0x11a   :  { %v309_v25 = vsel %vm308_vm3, %v307_v24, 0.0 }
 0x11b   :  { %310 = vst [vmem:[%s525_s3] sm:$0xff] %v309_v25 }

// kernel: resblock_forward.3
= control target key start
LH: loop header
LB: loop body
LE: loop exit
PB: predicated region body
PF: predicated region fallthrough
CT: control target
= control target key end

     0   :  { %vm122_vm0 = vcmask 1041408   ;;  %vm280_vm1 = vcmask 31744   ;;  %vm97_vm2 = vcmask 293888   ;;  %vm553_vm3 = vcmask 1040384   ;;  %s904_s3 = inlined_call_operand.vmem [shape: bf16[4,128], index: 3, kind: input, shape index: {}]   ;;  %s905_s2 = inlined_call_operand.vmem [shape: bf16[36,128], index: 2, kind: input, shape index: {}]   ;;  %s906_s1 = inlined_call_operand.vmem [shape: bf16[128,4], index: 1, kind: input, shape index: {}]   ;;  %s907_s0 = inlined_call_operand.vmem [shape: bf16[128,36], index: 0, kind: input, shape index: {}]   ;;  %s908_s5 = inlined_call_operand.vmem [shape: f32[128,128], index: 5, kind: output, shape index: {1}]   ;;  %s909_s4 = inlined_call_operand.vmem [shape: f32[128,128], index: 4, kind: output, shape index: {0}]   ;;  %s910_s6 = inlined_call_operand.vmem [shape: f32[1,8,128], index: 6, kind: output, shape index: {2}]  }
   0x1   :  { %v239_v0 = vld [vmem:[%s904_s3] sm:$0x3]  ;;  %v672_v4 = vld [vmem:[%s906_s1 + $0x8] sm:$0xff]   ;;  %v674_v6 = vld [vmem:[%s905_s2 + $0x10] ss:$0 sps:$4 sm:$0x33]  }
   0x2   :  { %669 = vmatprep.subr.msk.bf16.mxu1 %vm122_vm0, %v239_v0  ;;  %v306_v1 = vsel %vm122_vm0, %v239_v0, 0  ;;  %v670_v2 = vld [vmem:[%s905_s2] sm:$0xff]   ;;  %v673_v5 = vld [vmem:[%s905_s2 + $0x8] sm:$0xff]   ;;  %v675_v7 = vld [vmem:[%s906_s1 + $0x10] sm:$0xff]   ;;  %v124_v9 = vsel %vm122_vm0, %v674_v6, 0  ;;  %vm556_vm4 = vcmask 1042432  }
   0x3   :  { %651 = vmatpush3.bf16.msra.mxu1 %v306_v1  ;;  %v671_v3 = vld [vmem:[%s906_s1] sm:$0xff]   ;;  %628 = vmatprep.subr.bf16.mxu0 %v670_v2  ;;  %v676_v10 = vld [vmem:[%s906_s1 + $0x18] sm:$0xff]   ;;  %v678_v12 = vld [vmem:[%s907_s0 + $0x8] sm:$0xff]   ;;  %vm558_vm5 = vcmask 1043456  }
   0x4   :  { %629 = vmatpush3.bf16.msra.mxu0 %v670_v2  ;;  %652 = vmatprep.mubr.msk.bf16.mxu1 %vm280_vm1, %v671_v3  ;;  %v677_v8 = vld [vmem:[%s907_s0] sm:$0xff]   ;;  %v681_v13 = vld [vmem:[%s907_s0 + $0x10] sm:$0xff]   ;;  %v680_v14 = vld [vmem:[%s906_s1 + $0x28] sm:$0xff]  }
   0x5   :  { %630 = vmatprep.subr.bf16.mxu0 %v673_v5  ;;  %634 = vmatprep.mubr.msk.bf16.mxu0 %vm97_vm2, %v677_v8  ;;  %v679_v11 = vld [vmem:[%s906_s1 + $0x20] sm:$0xff]   ;;  %v683_v15 = vld [vmem:[%s906_s1 + $0x30] sm:$0xff]   ;;  %v682_v16 = vld [vmem:[%s907_s0 + $0x18] sm:$0xff]  }
   0x6   :  { %653 = vmatmul.mubr.msk.bf16.vlgmr.msra.gmra.mrb[0].mxu1 %vm280_vm1, %v672_v4  ;;  %v685_v17 = vld [vmem:[%s907_s0 + $0x20] sm:$0xff]   ;;  %v684_v18 = vld [vmem:[%s906_s1 + $0x38] sm:$0xff]   ;;  %v686_v19 = vld [vmem:[%s907_s0 + $0x28] sm:$0xff]  }
   0x7   :  { %656 = vmatprep.mubr.msk.bf16.mxu1 %vm280_vm1, %v675_v7  ;;  %v687_v20 = vld [vmem:[%s907_s0 + $0x30] sm:$0xff]   ;;  %v688_v21 = vld [vmem:[%s907_s0 + $0x38] sm:$0xff]  }
   0x8   :  { %631 = vmatpush3.bf16.msra.mxu0 %v673_v5 }
   0x9   :  { %668 = vmatprep.subr.msk.bf16.mxu0 %vm122_vm0, %v674_v6 }
   0xc   :  { %633 = vmatpush3.bf16.msra.mxu0 %v124_v9 }
   0xe   :  { %657 = vmatmul.mubr.msk.bf16.gmra.mrb[4].mxu1 %vm280_vm1, %v676_v10 }
   0xf   :  { %660 = vmatprep.mubr.msk.bf16.mxu1 %vm280_vm1, %v679_v11  ;;  %635 = vmatmul.mubr.msk.bf16.vlgmr.msra.gmra.mrb[0].mxu0 %vm97_vm2, %v678_v12 }
  0x10   :  { %638 = vmatprep.mubr.msk.bf16.mxu0 %vm97_vm2, %v681_v13 }
  0x16   :  { %661 = vmatmul.mubr.msk.bf16.gmra.mrb[8].mxu1 %vm280_vm1, %v680_v14 }
  0x17   :  { %664 = vmatprep.mubr.msk.bf16.mxu1 %vm280_vm1, %v683_v15  ;;  %639 = vmatmul.mubr.msk.bf16.gmra.mrb[4].mxu0 %vm97_vm2, %v682_v16 }
  0x18   :  { %642 = vmatprep.mubr.msk.bf16.mxu0 %vm97_vm2, %v685_v17 }
  0x1e   :  { %665 = vmatmul.mubr.msk.bf16.gmra.mrb[12].mxu1 %vm280_vm1, %v684_v18 }
  0x1f   :  { %643 = vmatmul.mubr.msk.bf16.gmra.mrb[8].mxu0 %vm97_vm2, %v686_v19 }
  0x20   :  { %646 = vmatprep.mubr.msk.bf16.mxu0 %vm97_vm2, %v687_v20 }
  0x27   :  { %647 = vmatmul.mubr.msk.bf16.gmra.mrb[12].mxu0 %vm97_vm2, %v688_v21 }
  0xd9   :  { %v654_v22 = vpop.f32.mrb[0].mxu1 }
  0xda   :  { %423 = vst [vmem:[%s908_s5 + $0x10] sm:$0xff] %v654_v22  ;;  %v342_v23 = vpop.f32.mrb[1].mxu1  ;;  %v518_v27 = vmul.f32 %v654_v22, %v654_v22 }
  0xdb   :  { %421 = vst [vmem:[%s908_s5] sm:$0xff] %v342_v23  ;;  %v516_v24 = vmul.f32 %v342_v23, %v342_v23  ;;  %v655_v25 = vpop.f32.mrb[2].mxu1 }
  0xdc   :  { %424 = vst [vmem:[%s908_s5 + $0x18] sm:$0xff] %v655_v25  ;;  %v345_v26 = vpop.f32.mrb[3].mxu1  ;;  %v519_v30 = vmul.f32 %v655_v25, %v655_v25 }
  0xdd   :  { %422 = vst [vmem:[%s908_s5 + $0x8] sm:$0xff] %v345_v26  ;;  %v495_v28 = vadd.f32 %v345_v26, %v342_v23  ;;  %v517_v29 = vmul.f32 %v345_v26, %v345_v26 }
  0xdf   :  { %v496_v31 = vadd.f32 %v654_v22, %v495_v28  ;;  %v532_v32 = vadd.f32 %v517_v29, %v516_v24 }
  0xe1   :  { %v533_v33 = vadd.f32 %v532_v32, %v518_v27  ;;  %v658_v34 = vpop.f32.mrb[4].mxu1  ;;  %v497_v35 = vadd.f32 %v655_v25, %v496_v31 }
  0xe2   :  { %427 = vst [vmem:[%s908_s5 + $0x30] sm:$0xff] %v658_v34  ;;  %v358_v36 = vpop.f32.mrb[5].mxu1  ;;  %v636_v40 = vpop.f32.mrb[0].mxu0  ;;  %v522_v44 = vmul.f32 %v658_v34, %v658_v34 }
  0xe3   :  { %425 = vst [vmem:[%s908_s5 + $0x20] sm:$0xff] %v358_v36  ;;  %v498_v37 = vadd.f32 %v497_v35, %v358_v36  ;;  %v520_v38 = vmul.f32 %v358_v36, %v358_v36  ;;  %v534_v39 = vadd.f32 %v533_v33, %v519_v30  ;;  %v659_v41 = vpop.f32.mrb[6].mxu1  ;;  %407 = vst [vmem:[%s909_s4 + $0x10] sm:$0xff] %v636_v40  ;;  %v160_v42 = vpop.f32.mrb[1].mxu0 }
  0xe4   :  { %428 = vst [vmem:[%s908_s5 + $0x38] sm:$0xff] %v659_v41  ;;  %v361_v43 = vpop.f32.mrb[7].mxu1  ;;  %405 = vst [vmem:[%s909_s4] sm:$0xff] %v160_v42  ;;  %v637_v48 = vpop.f32.mrb[2].mxu0  ;;  %v523_v49 = vmul.f32 %v659_v41, %v659_v41  ;;  %v458_v50 = vmul.f32 %v160_v42, %v160_v42  ;;  %v460_v56 = vmul.f32 %v636_v40, %v636_v40 }
  0xe5   :  { %v535_v45 = vadd.f32 %v534_v39, %v520_v38  ;;  %426 = vst [vmem:[%s908_s5 + $0x28] sm:$0xff] %v361_v43  ;;  %v499_v46 = vadd.f32 %v498_v37, %v361_v43  ;;  %v521_v47 = vmul.f32 %v361_v43, %v361_v43  ;;  %408 = vst [vmem:[%s909_s4 + $0x18] sm:$0xff] %v637_v48  ;;  %v163_v51 = vpop.f32.mrb[3].mxu0 }
  0xe6   :  { %406 = vst [vmem:[%s909_s4 + $0x8] sm:$0xff] %v163_v51  ;;  %v437_v54 = vadd.f32 %v163_v51, %v160_v42  ;;  %v459_v55 = vmul.f32 %v163_v51, %v163_v51  ;;  %v461_v62 = vmul.f32 %v637_v48, %v637_v48 }
  0xe7   :  { %v500_v52 = vadd.f32 %v658_v34, %v499_v46  ;;  %v536_v53 = vadd.f32 %v535_v45, %v521_v47 }
  0xe8   :  { %v438_v58 = vadd.f32 %v636_v40, %v437_v54  ;;  %v474_v59 = vadd.f32 %v459_v55, %v458_v50 }
  0xe9   :  { %v537_v57 = vadd.f32 %v536_v53, %v522_v44  ;;  %v662_v60 = vpop.f32.mrb[8].mxu1  ;;  %v501_v61 = vadd.f32 %v659_v41, %v500_v52 }
  0xea   :  { %431 = vst [vmem:[%s908_s5 + $0x50] sm:$0xff] %v662_v60  ;;  %v374_v63 = vpop.f32.mrb[9].mxu1  ;;  %v475_v0 = vadd.f32 %v474_v59, %v460_v56  ;;  %v640_v4 = vpop.f32.mrb[4].mxu0  ;;  %v439_v7 = vadd.f32 %v637_v48, %v438_v58  ;;  %v526_v14 = vmul.f32 %v662_v60, %v662_v60 }
  0xeb   :  { %429 = vst [vmem:[%s908_s5 + $0x40] sm:$0xff] %v374_v63  ;;  %v502_v1 = vadd.f32 %v501_v61, %v374_v63  ;;  %v524_v2 = vmul.f32 %v374_v63, %v374_v63  ;;  %v538_v3 = vadd.f32 %v537_v57, %v523_v49  ;;  %v663_v5 = vpop.f32.mrb[10].mxu1  ;;  %411 = vst [vmem:[%s909_s4 + $0x30] sm:$0xff] %v640_v4  ;;  %v176_v6 = vpop.f32.mrb[5].mxu0 }
  0xec   :  { %432 = vst [vmem:[%s908_s5 + $0x58] sm:$0xff] %v663_v5  ;;  %v377_v8 = vpop.f32.mrb[11].mxu1  ;;  %409 = vst [vmem:[%s909_s4 + $0x20] sm:$0xff] %v176_v6  ;;  %v462_v10 = vmul.f32 %v176_v6, %v176_v6  ;;  %v476_v11 = vadd.f32 %v475_v0, %v461_v62  ;;  %v641_v13 = vpop.f32.mrb[6].mxu0  ;;  %v440_v15 = vadd.f32 %v439_v7, %v176_v6 }
  0xed   :  { %v539_v9 = vadd.f32 %v538_v3, %v524_v2  ;;  %430 = vst [vmem:[%s908_s5 + $0x48] sm:$0xff] %v377_v8  ;;  %v503_v12 = vadd.f32 %v502_v1, %v377_v8  ;;  %v525_v16 = vmul.f32 %v377_v8, %v377_v8  ;;  %412 = vst [vmem:[%s909_s4 + $0x38] sm:$0xff] %v641_v13  ;;  %v179_v17 = vpop.f32.mrb[7].mxu0 }
  0xee   :  { %v477_v18 = vadd.f32 %v476_v11, %v462_v10  ;;  %410 = vst [vmem:[%s909_s4 + $0x28] sm:$0xff] %v179_v17  ;;  %v463_v20 = vmul.f32 %v179_v17, %v179_v17  ;;  %v527_v21 = vmul.f32 %v663_v5, %v663_v5  ;;  %v441_v23 = vadd.f32 %v440_v15, %v179_v17 }
  0xef   :  { %v504_v19 = vadd.f32 %v662_v60, %v503_v12  ;;  %v540_v22 = vadd.f32 %v539_v9, %v525_v16  ;;  %v464_v24 = vmul.f32 %v640_v4, %v640_v4  ;;  %v465_v31 = vmul.f32 %v641_v13, %v641_v13 }
  0xf0   :  { %v478_v25 = vadd.f32 %v477_v18, %v463_v20  ;;  %v442_v29 = vadd.f32 %v640_v4, %v441_v23 }
  0xf1   :  { %v666_v26 = vpop.f32.mrb[12].mxu1  ;;  %v505_v27 = vadd.f32 %v663_v5, %v504_v19  ;;  %v541_v28 = vadd.f32 %v540_v22, %v526_v14 }
  0xf2   :  { %435 = vst [vmem:[%s908_s5 + $0x70] sm:$0xff] %v666_v26  ;;  %v390_v30 = vpop.f32.mrb[13].mxu1  ;;  %v479_v32 = vadd.f32 %v478_v25, %v464_v24  ;;  %v644_v35 = vpop.f32.mrb[8].mxu0  ;;  %v443_v39 = vadd.f32 %v641_v13, %v442_v29  ;;  %v530_v46 = vmul.f32 %v666_v26, %v666_v26 }
  0xf3   :  { %433 = vst [vmem:[%s908_s5 + $0x60] sm:$0xff] %v390_v30  ;;  %v506_v33 = vadd.f32 %v505_v27, %v390_v30  ;;  %v528_v34 = vmul.f32 %v390_v30, %v390_v30  ;;  %v667_v36 = vpop.f32.mrb[14].mxu1  ;;  %v542_v37 = vadd.f32 %v541_v28, %v527_v21  ;;  %415 = vst [vmem:[%s909_s4 + $0x50] sm:$0xff] %v644_v35  ;;  %v192_v38 = vpop.f32.mrb[9].mxu0 }
  0xf4   :  { %436 = vst [vmem:[%s908_s5 + $0x78] sm:$0xff] %v667_v36  ;;  %v393_v40 = vpop.f32.mrb[15].mxu1  ;;  %413 = vst [vmem:[%s909_s4 + $0x40] sm:$0xff] %v192_v38  ;;  %v466_v41 = vmul.f32 %v192_v38, %v192_v38  ;;  %v480_v42 = vadd.f32 %v479_v32, %v465_v31  ;;  %v645_v45 = vpop.f32.mrb[10].mxu0  ;;  %v444_v48 = vadd.f32 %v443_v39, %v192_v38 }
  0xf5   :  { %434 = vst [vmem:[%s908_s5 + $0x68] sm:$0xff] %v393_v40  ;;  %v507_v43 = vadd.f32 %v506_v33, %v393_v40  ;;  %v529_v44 = vmul.f32 %v393_v40, %v393_v40  ;;  %v543_v47 = vadd.f32 %v542_v37, %v528_v34  ;;  %416 = vst [vmem:[%s909_s4 + $0x58] sm:$0xff] %v645_v45  ;;  %v195_v49 = vpop.f32.mrb[11].mxu0 }
  0xf6   :  { %v481_v50 = vadd.f32 %v480_v42, %v466_v41  ;;  %414 = vst [vmem:[%s909_s4 + $0x48] sm:$0xff] %v195_v49  ;;  %v467_v52 = vmul.f32 %v195_v49, %v195_v49  ;;  %v531_v53 = vmul.f32 %v667_v36, %v667_v36  ;;  %v445_v55 = vadd.f32 %v444_v48, %v195_v49 }
  0xf7   :  { %v508_v51 = vadd.f32 %v666_v26, %v507_v43  ;;  %v544_v54 = vadd.f32 %v543_v47, %v529_v44  ;;  %v468_v56 = vmul.f32 %v644_v35, %v644_v35  ;;  %v469_v61 = vmul.f32 %v645_v45, %v645_v45 }
  0xf8   :  { %v482_v58 = vadd.f32 %v481_v50, %v467_v52  ;;  %v446_v60 = vadd.f32 %v644_v35, %v445_v55 }
  0xf9   :  { %v509_v57 = vadd.f32 %v667_v36, %v508_v51  ;;  %v545_v59 = vadd.f32 %v544_v54, %v530_v46 }
  0xfa   :  { %v483_v62 = vadd.f32 %v482_v58, %v468_v56  ;;  %v648_v63 = vpop.f32.mrb[12].mxu0  ;;  %v447_v2 = vadd.f32 %v645_v45, %v446_v60 }
  0xfb   :  { %v546_v0 = vadd.f32 %v545_v59, %v531_v53  ;;  %419 = vst [vmem:[%s909_s4 + $0x70] sm:$0xff] %v648_v63  ;;  %v208_v1 = vpop.f32.mrb[13].mxu0  ;;  %v510_v6 = vrot.slane %v509_v57, 4  ;;  %v472_v13 = vmul.f32 %v648_v63, %v648_v63 }
  0xfc   :  { %417 = vst [vmem:[%s909_s4 + $0x60] sm:$0xff] %v208_v1  ;;  %v470_v3 = vmul.f32 %v208_v1, %v208_v1  ;;  %v484_v4 = vadd.f32 %v483_v62, %v469_v61  ;;  %v649_v5 = vpop.f32.mrb[14].mxu0  ;;  %v448_v7 = vadd.f32 %v447_v2, %v208_v1 }
  0xfd   :  { %420 = vst [vmem:[%s909_s4 + $0x78] sm:$0xff] %v649_v5  ;;  %v211_v8 = vpop.f32.mrb[15].mxu0  ;;  %v547_v9 = vrot.slane %v546_v0, 4  ;;  %v511_v15 = vadd.f32 %v510_v6, %v509_v57  ;;  %v473_v18 = vmul.f32 %v649_v5, %v649_v5 }
  0xfe   :  { %v485_v10 = vadd.f32 %v484_v4, %v470_v3  ;;  %418 = vst [vmem:[%s909_s4 + $0x68] sm:$0xff] %v211_v8  ;;  %v471_v11 = vmul.f32 %v211_v8, %v211_v8  ;;  %v449_v12 = vadd.f32 %v448_v7, %v211_v8 }
  0xff   :  { %v548_v17 = vadd.f32 %v547_v9, %v546_v0  ;;  %v512_v22 = vrot.slane %v511_v15, 2 }
 0x100   :  { %v486_v14 = vadd.f32 %v485_v10, %v471_v11  ;;  %v450_v16 = vadd.f32 %v648_v63, %v449_v12 }
 0x101   :  { %v549_v24 = vrot.slane %v548_v17, 2  ;;  %v513_v28 = vadd.f32 %v512_v22, %v511_v15 }
 0x102   :  { %v487_v19 = vadd.f32 %v486_v14, %v472_v13  ;;  %v451_v20 = vadd.f32 %v649_v5, %v450_v16 }
 0x103   :  { %v550_v30 = vadd.f32 %v549_v24, %v548_v17  ;;  %v514_v34 = vrot.slane %v513_v28, 1 }
 0x104   :  { %v488_v21 = vadd.f32 %v487_v19, %v473_v18  ;;  %v452_v23 = vrot.slane %v451_v20, 4 }
 0x105   :  { %v551_v36 = vrot.slane %v550_v30, 1  ;;  %v515_v40 = vadd.f32 %v514_v34, %v513_v28 }
 0x106   :  { %v489_v25 = vrot.slane %v488_v21, 4  ;;  %v453_v26 = vadd.f32 %v452_v23, %v451_v20 }
 0x107   :  { %v552_v41 = vadd.f32 %v551_v36, %v550_v30 }
 0x108   :  { %v490_v27 = vadd.f32 %v489_v25, %v488_v21  ;;  %v454_v29 = vrot.slane %v453_v26, 2 }
 0x10a   :  { %v491_v31 = vrot.slane %v490_v27, 2  ;;  %v455_v32 = vadd.f32 %v454_v29, %v453_v26 }
 0x10c   :  { %v492_v33 = vadd.f32 %v491_v31, %v490_v27  ;;  %v456_v35 = vrot.slane %v455_v32, 1 }
 0x10e   :  { %v493_v37 = vrot.slane %v492_v33, 1  ;;  %v457_v38 = vadd.f32 %v456_v35, %v455_v32 }
 0x110   :  { %v494_v39 = vadd.f32 %v493_v37, %v492_v33 }
 0x112   :  { %v554_v42 = vsel %vm553_vm3, %v457_v38, %v494_v39 }
 0x113   :  { %v555_v43 = vsel %vm122_vm0, %v554_v42, %v515_v40 }
 0x114   :  { %v557_v44 = vsel %vm556_vm4, %v555_v43, %v552_v41 }
 0x115   :  { %v559_v45 = vsel %vm558_vm5, %v557_v44, 0.0 }
 0x116   :  { %560 = vst [vmem:[%s910_s6] sm:$0xff] %v559_v45 }

// kernel: resblock_forward.5
= control target key start
LH: loop header
LB: loop body
LE: loop exit
PB: predicated region body
PF: predicated region fallthrough
CT: control target
= control target key end

     0   :  { %s434_s0 = inlined_call_operand.vmem [shape: f32[128,128], index: 0, kind: input, shape index: {}]   ;;  %s435_s1 = inlined_call_operand.vmem [shape: f32[128,128], index: 1, kind: input, shape index: {}]   ;;  %s436_s2 = inlined_call_operand.vmem [shape: f32[8,128], index: 2, kind: input, shape index: {}]   ;;  %s437_s3 = inlined_call_operand.vmem [shape: f32[128,128], index: 3, kind: output, shape index: {}]  }
   0x1   :  { %v14_v0 = vld [vmem:[%s434_s0] sm:$0xff]  ;;  %v15_v8 = vld [vmem:[%s434_s0 + $0x8] sm:$0xff]  ;;  %v16_v10 = vld [vmem:[%s434_s0 + $0x10] sm:$0xff] }
   0x2   :  { %v212_v1 = vld [vmem:[%s436_s2] ss:$0 sm:$0xff]  ;;  %v217_v2 = vld [vmem:[%s436_s2 + $0x1] ss:$0 sm:$0xff]  ;;  %v226_v5 = vld [vmem:[%s436_s2 + $0x2] ss:$0 sm:$0xff] }
   0x3   :  { %v35_v3 = vmul.f32 %v212_v1, %v14_v0  ;;  %v72_v4 = vld [vmem:[%s435_s1] sm:$0xff]  ;;  %v73_v9 = vld [vmem:[%s435_s1 + $0x8] sm:$0xff]  ;;  %v36_v12 = vmul.f32 %v212_v1, %v15_v8  ;;  %v37_v14 = vmul.f32 %v212_v1, %v16_v10  ;;  %v74_v15 = vld [vmem:[%s435_s1 + $0x10] sm:$0xff] }
   0x4   :  { %v231_v6 = vld [vmem:[%s436_s2 + $0x3] ss:$0 sm:$0xff]  ;;  %v93_v7 = vmul.f32 %v226_v5, %v72_v4  ;;  %v94_v13 = vmul.f32 %v226_v5, %v73_v9  ;;  %v17_v16 = vld [vmem:[%s434_s0 + $0x18] sm:$0xff]  ;;  %v95_v19 = vmul.f32 %v226_v5, %v74_v15  ;;  %v19_v24 = vld [vmem:[%s434_s0 + $0x28] sm:$0xff] }
   0x5   :  { %v56_v11 = vadd.f32 %v217_v2, %v35_v3  ;;  %v75_v17 = vld [vmem:[%s435_s1 + $0x18] sm:$0xff]  ;;  %v38_v20 = vmul.f32 %v212_v1, %v17_v16  ;;  %v18_v22 = vld [vmem:[%s434_s0 + $0x20] sm:$0xff]  ;;  %v57_v25 = vadd.f32 %v217_v2, %v36_v12  ;;  %v58_v27 = vadd.f32 %v217_v2, %v37_v14  ;;  %v77_v29 = vld [vmem:[%s435_s1 + $0x28] sm:$0xff] }
   0x6   :  { %v114_v18 = vadd.f32 %v231_v6, %v93_v7  ;;  %v96_v21 = vmul.f32 %v226_v5, %v75_v17  ;;  %v76_v23 = vld [vmem:[%s435_s1 + $0x20] sm:$0xff]  ;;  %v115_v26 = vadd.f32 %v231_v6, %v94_v13  ;;  %v39_v28 = vmul.f32 %v212_v1, %v18_v22  ;;  %v20_v34 = vld [vmem:[%s434_s0 + $0x30] sm:$0xff]  ;;  %v21_v44 = vld [vmem:[%s434_s0 + $0x38] sm:$0xff] }
   0x7   :  { %v116_v31 = vadd.f32 %v231_v6, %v95_v19  ;;  %v59_v32 = vadd.f32 %v217_v2, %v38_v20  ;;  %v97_v37 = vmul.f32 %v226_v5, %v76_v23  ;;  %v40_v38 = vmul.f32 %v212_v1, %v19_v24  ;;  %v78_v39 = vld [vmem:[%s435_s1 + $0x30] sm:$0xff]  ;;  %v79_v45 = vld [vmem:[%s435_s1 + $0x38] sm:$0xff]  ;;  %v22_v50 = vld [vmem:[%s434_s0 + $0x40] sm:$0xff] }
   0x8   :  { %v130_v30 = vadd.f32 %v114_v18, %v56_v11  ;;  %v117_v33 = vadd.f32 %v231_v6, %v96_v21  ;;  %v131_v35 = vadd.f32 %v115_v26, %v57_v25  ;;  %v60_v36 = vadd.f32 %v217_v2, %v39_v28  ;;  %v80_v51 = vld [vmem:[%s435_s1 + $0x40] sm:$0xff]  ;;  %v23_v56 = vld [vmem:[%s434_s0 + $0x48] sm:$0xff]  ;;  %v24_v4 = vld [vmem:[%s434_s0 + $0x50] sm:$0xff] }
   0x9   :  { %v132_v41 = vadd.f32 %v116_v31, %v58_v27  ;;  %v98_v43 = vmul.f32 %v226_v5, %v77_v29  ;;  %v118_v47 = vadd.f32 %v231_v6, %v97_v37  ;;  %v61_v48 = vadd.f32 %v217_v2, %v40_v38  ;;  %v81_v3 = vld [vmem:[%s435_s1 + $0x48] sm:$0xff]  ;;  %v82_v11 = vld [vmem:[%s435_s1 + $0x50] sm:$0xff]  ;;  %v25_v12 = vld [vmem:[%s434_s0 + $0x58] sm:$0xff] }
   0xa   :  { %v146_v40 = vmax.f32 %v130_v30, 0.0  ;;  %v133_v42 = vadd.f32 %v117_v33, %v59_v32  ;;  %v147_v46 = vmax.f32 %v131_v35, 0.0  ;;  %v41_v49 = vmul.f32 %v212_v1, %v20_v34  ;;  %v83_v17 = vld [vmem:[%s435_s1 + $0x58] sm:$0xff]  ;;  %v26_v22 = vld [vmem:[%s434_s0 + $0x60] sm:$0xff]  ;;  %v27_v28 = vld [vmem:[%s434_s0 + $0x68] sm:$0xff] }
   0xb   :  { %v148_v52 = vmax.f32 %v132_v41, 0.0  ;;  %v119_v54 = vadd.f32 %v231_v6, %v98_v43  ;;  %v99_v55 = vmul.f32 %v226_v5, %v78_v39  ;;  %v134_v57 = vadd.f32 %v118_v47, %v60_v36  ;;  %v84_v27 = vld [vmem:[%s435_s1 + $0x60] sm:$0xff]  ;;  %v85_v33 = vld [vmem:[%s435_s1 + $0x68] sm:$0xff]  ;;  %v28_v34 = vld [vmem:[%s434_s0 + $0x70] sm:$0xff] }
   0xc   :  { %162 = vst [vmem:[%s437_s3] sm:$0xff] %v146_v40  ;;  %v149_v53 = vmax.f32 %v133_v42, 0.0  ;;  %163 = vst [vmem:[%s437_s3 + $0x8] sm:$0xff] %v147_v46  ;;  %v62_v58 = vadd.f32 %v217_v2, %v41_v49  ;;  %v42_v59 = vmul.f32 %v212_v1, %v21_v44  ;;  %v100_v60 = vmul.f32 %v226_v5, %v79_v45  ;;  %v86_v43 = vld [vmem:[%s435_s1 + $0x70] sm:$0xff]  ;;  %v87_v49 = vld [vmem:[%s435_s1 + $0x78] sm:$0xff] }
   0xd   :  { %164 = vst [vmem:[%s437_s3 + $0x10] sm:$0xff] %v148_v52  ;;  %v135_v61 = vadd.f32 %v119_v54, %v61_v48  ;;  %v120_v62 = vadd.f32 %v231_v6, %v99_v55  ;;  %v43_v63 = vmul.f32 %v212_v1, %v22_v50  ;;  %v101_v0 = vmul.f32 %v226_v5, %v80_v51  ;;  %v29_v48 = vld [vmem:[%s434_s0 + $0x78] sm:$0xff] }
   0xe   :  { %165 = vst [vmem:[%s437_s3 + $0x18] sm:$0xff] %v149_v53  ;;  %v150_v7 = vmax.f32 %v134_v57, 0.0  ;;  %v63_v8 = vadd.f32 %v217_v2, %v42_v59  ;;  %v121_v9 = vadd.f32 %v231_v6, %v100_v60  ;;  %v44_v10 = vmul.f32 %v212_v1, %v23_v56 }
   0xf   :  { %v151_v13 = vmax.f32 %v135_v61, 0.0  ;;  %v136_v14 = vadd.f32 %v120_v62, %v62_v58  ;;  %v64_v15 = vadd.f32 %v217_v2, %v43_v63  ;;  %v122_v16 = vadd.f32 %v231_v6, %v101_v0 }
  0x10   :  { %166 = vst [vmem:[%s437_s3 + $0x20] sm:$0xff] %v150_v7  ;;  %v137_v18 = vadd.f32 %v121_v9, %v63_v8  ;;  %v65_v19 = vadd.f32 %v217_v2, %v44_v10  ;;  %v102_v20 = vmul.f32 %v226_v5, %v81_v3  ;;  %v45_v21 = vmul.f32 %v212_v1, %v24_v4 }
  0x11   :  { %167 = vst [vmem:[%s437_s3 + $0x28] sm:$0xff] %v151_v13  ;;  %v152_v23 = vmax.f32 %v136_v14, 0.0  ;;  %v138_v24 = vadd.f32 %v122_v16, %v64_v15  ;;  %v103_v25 = vmul.f32 %v226_v5, %v82_v11  ;;  %v46_v26 = vmul.f32 %v212_v1, %v25_v12 }
  0x12   :  { %v153_v29 = vmax.f32 %v137_v18, 0.0  ;;  %v123_v30 = vadd.f32 %v231_v6, %v102_v20  ;;  %v66_v31 = vadd.f32 %v217_v2, %v45_v21  ;;  %v104_v32 = vmul.f32 %v226_v5, %v83_v17 }
  0x13   :  { %168 = vst [vmem:[%s437_s3 + $0x30] sm:$0xff] %v152_v23  ;;  %v154_v35 = vmax.f32 %v138_v24, 0.0  ;;  %v124_v36 = vadd.f32 %v231_v6, %v103_v25  ;;  %v67_v37 = vadd.f32 %v217_v2, %v46_v26  ;;  %v47_v38 = vmul.f32 %v212_v1, %v26_v22 }
  0x14   :  { %169 = vst [vmem:[%s437_s3 + $0x38] sm:$0xff] %v153_v29  ;;  %v139_v39 = vadd.f32 %v123_v30, %v65_v19  ;;  %v125_v40 = vadd.f32 %v231_v6, %v104_v32  ;;  %v105_v41 = vmul.f32 %v226_v5, %v84_v27  ;;  %v48_v42 = vmul.f32 %v212_v1, %v27_v28 }
  0x15   :  { %170 = vst [vmem:[%s437_s3 + $0x40] sm:$0xff] %v154_v35  ;;  %v140_v44 = vadd.f32 %v124_v36, %v66_v31  ;;  %v68_v45 = vadd.f32 %v217_v2, %v47_v38  ;;  %v106_v46 = vmul.f32 %v226_v5, %v85_v33  ;;  %v49_v47 = vmul.f32 %v212_v1, %v28_v34 }
  0x16   :  { %v155_v50 = vmax.f32 %v139_v39, 0.0  ;;  %v141_v51 = vadd.f32 %v125_v40, %v67_v37  ;;  %v126_v52 = vadd.f32 %v231_v6, %v105_v41  ;;  %v69_v53 = vadd.f32 %v217_v2, %v48_v42 }
  0x17   :  { %v156_v54 = vmax.f32 %v140_v44, 0.0  ;;  %v127_v55 = vadd.f32 %v231_v6, %v106_v46  ;;  %v70_v56 = vadd.f32 %v217_v2, %v49_v47  ;;  %v107_v57 = vmul.f32 %v226_v5, %v86_v43 }
  0x18   :  { %171 = vst [vmem:[%s437_s3 + $0x48] sm:$0xff] %v155_v50  ;;  %v157_v58 = vmax.f32 %v141_v51, 0.0  ;;  %v142_v59 = vadd.f32 %v126_v52, %v68_v45  ;;  %v50_v60 = vmul.f32 %v212_v1, %v29_v48  ;;  %v108_v61 = vmul.f32 %v226_v5, %v87_v49 }
  0x19   :  { %172 = vst [vmem:[%s437_s3 + $0x50] sm:$0xff] %v156_v54  ;;  %v143_v62 = vadd.f32 %v127_v55, %v69_v53  ;;  %v128_v63 = vadd.f32 %v231_v6, %v107_v57 }
  0x1a   :  { %173 = vst [vmem:[%s437_s3 + $0x58] sm:$0xff] %v157_v58  ;;  %v158_v0 = vmax.f32 %v142_v59, 0.0  ;;  %v71_v3 = vadd.f32 %v217_v2, %v50_v60  ;;  %v129_v4 = vadd.f32 %v231_v6, %v108_v61 }
  0x1b   :  { %v159_v7 = vmax.f32 %v143_v62, 0.0  ;;  %v144_v1 = vadd.f32 %v128_v63, %v70_v56 }
  0x1c   :  { %174 = vst [vmem:[%s437_s3 + $0x60] sm:$0xff] %v158_v0  ;;  %v145_v5 = vadd.f32 %v129_v4, %v71_v3 }
  0x1d   :  { %175 = vst [vmem:[%s437_s3 + $0x68] sm:$0xff] %v159_v7  ;;  %v160_v8 = vmax.f32 %v144_v1, 0.0 }
  0x1e   :  { %v161_v9 = vmax.f32 %v145_v5, 0.0 }
  0x1f   :  { %176 = vst [vmem:[%s437_s3 + $0x70] sm:$0xff] %v160_v8 }
  0x20   :  { %177 = vst [vmem:[%s437_s3 + $0x78] sm:$0xff] %v161_v9 }

</bundles_post_ra>
